<compile_context>
chip_gen: v7x
topology: tpu7x:2x2x1
jax: 0.10.0
libtpu: 0.0.40
codegen_flags: <defaults>
</compile_context>

<pallas_src>
import math

import jax
import jax.numpy as jnp
from jax.experimental import pallas as pl
from jax.experimental.pallas import tpu as pltpu

# ---- Model config (small, consistent with the module) ----
N_EMBD = 32
N_HEAD = 4
HEAD_DIM = N_EMBD // N_HEAD
BLOCK_SIZE = 16          # cfg.block_size (max sequence length)
LN_EPS = 1e-5
GELU_C = math.sqrt(2.0 / math.pi)
NEG_INF = -1e30          # finite large-negative masking constant
SCALE = 1.0 / math.sqrt(HEAD_DIM)


# ---------------- in-kernel helpers (traced into the Pallas body) ----------------
def _layer_norm(x, w, b):
    mean = jnp.mean(x, axis=-1, keepdims=True)
    var = jnp.mean((x - mean) ** 2, axis=-1, keepdims=True)
    return (x - mean) * jax.lax.rsqrt(var + LN_EPS) * w + b


def _new_gelu(x):
    return 0.5 * x * (1.0 + jnp.tanh(GELU_C * (x + 0.044715 * x * x * x)))


def _bmm(a, b):
    # (G, M, K) @ (G, K, N) -> (G, M, N), single leading batch dim
    return jax.lax.dot_general(a, b, (((2,), (1,)), ((0,), (0,))),
                               preferred_element_type=jnp.float32)


def _bmm_nt(a, b):
    # (G, M, K) @ (G, N, K)^T -> (G, M, N), single leading batch dim
    return jax.lax.dot_general(a, b, (((2,), (2,)), ((0,), (0,))),
                               preferred_element_type=jnp.float32)


# ---------------- Pallas kernel: one full Block for the whole batch ----------------
def block_kernel(x_ref, wqkv_ref, wo_ref, wfc_ref, wcp_ref,
                 lnp_ref, battn_ref, bfc_ref, o_ref):
    B, T, C = x_ref.shape
    H, D = N_HEAD, HEAD_DIM

    x = x_ref[...].reshape(B * T, C)          # merge leading dims: free reshape

    # ---- ln_1 + fused QKV projection (ONE MXU matmul) ----
    h1 = _layer_norm(x, lnp_ref[0], lnp_ref[1])                              # (B*T, C)
    qkv = jnp.dot(h1, wqkv_ref[...],
                  preferred_element_type=jnp.float32) + battn_ref[...]       # (B*T, 3C)

    # ---- head split: static sublane/lane slices, batched over B*H ----
    def split_heads(comp):
        parts = []
        for b in range(B):
            for h in range(H):
                off = comp * C + h * D
                parts.append(qkv[b * T:(b + 1) * T, off:off + D])            # (T, D)
        return jnp.stack(parts, axis=0)                                      # (B*H, T, D)

    q = split_heads(0)
    k = split_heads(1)
    v = split_heads(2)

    # ---- causal softmax attention (mask built in-kernel) ----
    s = _bmm_nt(q, k) * SCALE                                                # (B*H, T, T)
    row = jax.lax.broadcasted_iota(jnp.int32, (T, T), 0)
    col = jax.lax.broadcasted_iota(jnp.int32, (T, T), 1)
    mask = jnp.where(row >= col, 0.0, NEG_INF).astype(jnp.float32)           # additive mask
    s = s + mask[None, :, :]
    # keep the row-max subtraction coupled with the finite NEG_INF mask (masked logits -> exp == 0)
    s = s - jnp.max(s, axis=-1, keepdims=True)
    p = jnp.exp(s)
    p = p * pl.reciprocal(jnp.sum(p, axis=-1, keepdims=True), approx=True)
    o = _bmm(p, v)                                                           # (B*H, T, D)

    # ---- merge heads back into lanes + single (C, C) output projection ----
    y = jnp.concatenate(
        [jnp.concatenate([o[b * H + h] for h in range(H)], axis=-1)          # (T, C)
         for b in range(B)], axis=0)                                         # (B*T, C)
    y = jnp.dot(y, wo_ref[...], preferred_element_type=jnp.float32) + lnp_ref[4]
    x = x + y

    # ---- ln_2 + MLP (c_fc -> NewGELU -> c_proj) ----
    h2 = _layer_norm(x, lnp_ref[2], lnp_ref[3])
    m = jnp.dot(h2, wfc_ref[...], preferred_element_type=jnp.float32) + bfc_ref[...]
    m = _new_gelu(m)
    x = x + jnp.dot(m, wcp_ref[...], preferred_element_type=jnp.float32) + lnp_ref[5]

    # TODO(synk): if T*C grows, present a lane-dense (multiple-of-128) output slab to get
    # unmasked vst; at C=32 the masked partial store is negligible.
    o_ref[...] = x.reshape(B, T, C)


# ---------------- wrapper ----------------
def prepare_block_params(raw):
    """Repack PyTorch-style (pre-transposed to (in,out)) Block params for the kernel."""
    (ln1_w, ln1_b, w_attn, b_attn, w_proj, b_proj,
     ln2_w, ln2_b, w_fc, b_fc, w_cp, b_cp) = raw
    C = N_EMBD
    lnp = jnp.stack([ln1_w, ln1_b, ln2_w, ln2_b, b_proj, b_cp], axis=0)      # (6, C)
    battn = b_attn.reshape(1, 3 * C)                                         # (1, 3C) lane-dense
    bfc = b_fc.reshape(1, 4 * C)                                             # (1, 4C) lane-dense
    return (w_attn, w_proj, w_fc, w_cp, lnp, battn, bfc)


def block_forward(x, kparams):
    """x: (B, T, C) float32 -> (B, T, C) float32 (Block.forward, dropout = 0)."""
    B, T, C = x.shape
    assert T <= BLOCK_SIZE and C == N_EMBD
    wqkv, wo, wfc, wcp, lnp, battn, bfc = kparams
    args = (x, wqkv, wo, wfc, wcp, lnp, battn, bfc)

    # Single grid step: every operand is a full-array VMEM block (total resident data
    # well under 100 KiB, so no generation-specific VMEM limit comes close to binding).
    vmem_spec = pl.BlockSpec(memory_space=pltpu.MemorySpace.VMEM)

    return pl.pallas_call(
        block_kernel,
        out_shape=jax.ShapeDtypeStruct((B, T, C), jnp.float32),
        in_specs=[vmem_spec] * len(args),
        out_specs=vmem_spec,
    )(*args)


# ---------------- pure-JAX reference (mirrors the PyTorch non-flash path) ----------------
def reference_block(x, raw):
    (ln1_w, ln1_b, w_attn, b_attn, w_proj, b_proj,
     ln2_w, ln2_b, w_fc, b_fc, w_cp, b_cp) = raw
    B, T, C = x.shape
    H, D = N_HEAD, HEAD_DIM
    h = _layer_norm(x, ln1_w, ln1_b)
    qkv = h @ w_attn + b_attn
    q, k, v = jnp.split(qkv, 3, axis=-1)
    q = q.reshape(B, T, H, D).transpose(0, 2, 1, 3)
    k = k.reshape(B, T, H, D).transpose(0, 2, 1, 3)
    v = v.reshape(B, T, H, D).transpose(0, 2, 1, 3)
    att = jnp.einsum("bhqd,bhkd->bhqk", q, k) * (1.0 / math.sqrt(D))
    causal = jnp.tril(jnp.ones((T, T), bool))
    att = jnp.where(causal[None, None], att, -jnp.inf)
    att = jax.nn.softmax(att, axis=-1)
    y = jnp.einsum("bhqk,bhkd->bhqd", att, v)
    y = y.transpose(0, 2, 1, 3).reshape(B, T, C)
    x = x + (y @ w_proj + b_proj)
    h2 = _layer_norm(x, ln2_w, ln2_b)
    x = x + (_new_gelu(h2 @ w_fc + b_fc) @ w_cp + b_cp)
    return x


if __name__ == "__main__":
    key = jax.random.PRNGKey(0)
    ks = jax.random.split(key, 16)
    C, H, D = N_EMBD, N_HEAD, HEAD_DIM
    std = 0.02
    raw = (
        1.0 + 0.1 * jax.random.normal(ks[0], (C,)),        # ln1 weight
        0.1 * jax.random.normal(ks[1], (C,)),              # ln1 bias
        std * jax.random.normal(ks[2], (C, 3 * C)),        # c_attn weight (in, out)
        0.01 * jax.random.normal(ks[3], (3 * C,)),         # c_attn bias
        std * jax.random.normal(ks[4], (C, C)),            # attn c_proj weight (in, out)
        0.01 * jax.random.normal(ks[5], (C,)),             # attn c_proj bias
        1.0 + 0.1 * jax.random.normal(ks[6], (C,)),        # ln2 weight
        0.1 * jax.random.normal(ks[7], (C,)),              # ln2 bias
        std * jax.random.normal(ks[8], (C, 4 * C)),        # mlp c_fc weight (in, out)
        0.01 * jax.random.normal(ks[9], (4 * C,)),         # mlp c_fc bias
        std * jax.random.normal(ks[10], (4 * C, C)),       # mlp c_proj weight (in, out)
        0.01 * jax.random.normal(ks[11], (C,)),            # mlp c_proj bias
    )
    raw = tuple(p.astype(jnp.float32) for p in raw)
    kparams = prepare_block_params(raw)

    B, T = 2, 8
    x = jax.random.normal(ks[12], (B, T, C), jnp.float32)

    y = block_forward(x, kparams)
    y = jax.block_until_ready(y)
    assert y.shape == (B, T, C)

    y_ref = reference_block(x, raw)
    max_diff = float(jnp.max(jnp.abs(y - y_ref)))
    assert max_diff < 1e-2, f"mismatch vs reference: {max_diff}"

    print("KERNEL_OK")
</pallas_src>

<mosaic_0001>
module attributes {stable_mosaic.version = 11 : i64} {
  func.func @block_kernel(%arg0: memref<2x8x32xf32, #tpu.memory_space<vmem>>, %arg1: memref<32x96xf32, #tpu.memory_space<vmem>>, %arg2: memref<32x32xf32, #tpu.memory_space<vmem>>, %arg3: memref<32x128xf32, #tpu.memory_space<vmem>>, %arg4: memref<128x32xf32, #tpu.memory_space<vmem>>, %arg5: memref<6x32xf32, #tpu.memory_space<vmem>>, %arg6: memref<1x96xf32, #tpu.memory_space<vmem>>, %arg7: memref<1x128xf32, #tpu.memory_space<vmem>>, %arg8: memref<2x8x32xf32, #tpu.memory_space<vmem>>) attributes {dimension_semantics = [], scalar_prefetch = 0 : i64, scratch_operands = 0 : i64, tpu.core_type = #tpu.core_type<tc>} {
    %c0 = arith.constant 0 : index
    %c0_0 = arith.constant 0 : index
    %c0_1 = arith.constant 0 : index
    %0 = vector.load %arg0[%c0, %c0_0, %c0_1] : memref<2x8x32xf32, #tpu.memory_space<vmem>>, vector<2x8x32xf32>
    %1 = vector.shape_cast %0 : vector<2x8x32xf32> to vector<16x32xf32>
    %c0_2 = arith.constant 0 : index
    %c0_3 = arith.constant 0 : index
    %2 = vector.load %arg5[%c0_2, %c0_3] : memref<6x32xf32, #tpu.memory_space<vmem>>, vector<1x32xf32>
    %3 = vector.shape_cast %2 : vector<1x32xf32> to vector<32xf32>
    %c1 = arith.constant 1 : index
    %c0_4 = arith.constant 0 : index
    %4 = vector.load %arg5[%c1, %c0_4] : memref<6x32xf32, #tpu.memory_space<vmem>>, vector<1x32xf32>
    %5 = vector.shape_cast %4 : vector<1x32xf32> to vector<32xf32>
    %cst = arith.constant dense<0.000000e+00> : vector<16xf32>
    %6 = vector.multi_reduction <add>, %1, %cst [1] : vector<16x32xf32> to vector<16xf32>
    %7 = vector.shape_cast %6 : vector<16xf32> to vector<16x1xf32>
    %cst_5 = arith.constant 3.200000e+01 : f32
    %8 = vector.broadcast %cst_5 : f32 to vector<16x1xf32>
    %9 = arith.divf %7, %8 : vector<16x1xf32>
    %10 = vector.broadcast %9 : vector<16x1xf32> to vector<16x32xf32>
    %11 = arith.subf %1, %10 : vector<16x32xf32>
    %12 = arith.mulf %11, %11 : vector<16x32xf32>
    %cst_6 = arith.constant dense<0.000000e+00> : vector<16xf32>
    %13 = vector.multi_reduction <add>, %12, %cst_6 [1] : vector<16x32xf32> to vector<16xf32>
    %14 = vector.shape_cast %13 : vector<16xf32> to vector<16x1xf32>
    %cst_7 = arith.constant 3.200000e+01 : f32
    %15 = vector.broadcast %cst_7 : f32 to vector<16x1xf32>
    %16 = arith.divf %14, %15 : vector<16x1xf32>
    %17 = vector.broadcast %9 : vector<16x1xf32> to vector<16x32xf32>
    %18 = arith.subf %1, %17 : vector<16x32xf32>
    %cst_8 = arith.constant 9.99999974E-6 : f32
    %19 = vector.broadcast %cst_8 : f32 to vector<16x1xf32>
    %20 = arith.addf %16, %19 : vector<16x1xf32>
    %21 = math.rsqrt %20 : vector<16x1xf32>
    %22 = vector.broadcast %21 : vector<16x1xf32> to vector<16x32xf32>
    %23 = arith.mulf %18, %22 : vector<16x32xf32>
    %24 = vector.shape_cast %3 : vector<32xf32> to vector<1x32xf32>
    %25 = vector.broadcast %24 : vector<1x32xf32> to vector<16x32xf32>
    %26 = arith.mulf %23, %25 : vector<16x32xf32>
    %27 = vector.shape_cast %5 : vector<32xf32> to vector<1x32xf32>
    %28 = vector.broadcast %27 : vector<1x32xf32> to vector<16x32xf32>
    %29 = arith.addf %26, %28 : vector<16x32xf32>
    %c0_9 = arith.constant 0 : index
    %c0_10 = arith.constant 0 : index
    %30 = vector.load %arg1[%c0_9, %c0_10] : memref<32x96xf32, #tpu.memory_space<vmem>>, vector<32x96xf32>
    %cst_11 = arith.constant dense<0.000000e+00> : vector<16x96xf32>
    %31 = tpu.matmul %29, %30, %cst_11 {dimension_numbers = #tpu.dot_dimension_numbers<[1], [0], [0], [1], [0, 0, 1, 1], [], []>} : vector<16x32xf32>, vector<32x96xf32>, vector<16x96xf32> -> vector<16x96xf32>
    %c0_12 = arith.constant 0 : index
    %c0_13 = arith.constant 0 : index
    %32 = vector.load %arg6[%c0_12, %c0_13] : memref<1x96xf32, #tpu.memory_space<vmem>>, vector<1x96xf32>
    %33 = vector.broadcast %32 : vector<1x96xf32> to vector<16x96xf32>
    %34 = arith.addf %31, %33 : vector<16x96xf32>
    %35 = vector.extract_strided_slice %34 {offsets = [0, 0], sizes = [8, 8], strides = [1, 1]} : vector<16x96xf32> to vector<8x8xf32>
    %36 = vector.extract_strided_slice %34 {offsets = [0, 8], sizes = [8, 8], strides = [1, 1]} : vector<16x96xf32> to vector<8x8xf32>
    %37 = vector.extract_strided_slice %34 {offsets = [0, 16], sizes = [8, 8], strides = [1, 1]} : vector<16x96xf32> to vector<8x8xf32>
    %38 = vector.extract_strided_slice %34 {offsets = [0, 24], sizes = [8, 8], strides = [1, 1]} : vector<16x96xf32> to vector<8x8xf32>
    %39 = vector.extract_strided_slice %34 {offsets = [8, 0], sizes = [8, 8], strides = [1, 1]} : vector<16x96xf32> to vector<8x8xf32>
    %40 = vector.extract_strided_slice %34 {offsets = [8, 8], sizes = [8, 8], strides = [1, 1]} : vector<16x96xf32> to vector<8x8xf32>
    %41 = vector.extract_strided_slice %34 {offsets = [8, 16], sizes = [8, 8], strides = [1, 1]} : vector<16x96xf32> to vector<8x8xf32>
    %42 = vector.extract_strided_slice %34 {offsets = [8, 24], sizes = [8, 8], strides = [1, 1]} : vector<16x96xf32> to vector<8x8xf32>
    %43 = vector.shape_cast %35 : vector<8x8xf32> to vector<1x8x8xf32>
    %44 = vector.shape_cast %36 : vector<8x8xf32> to vector<1x8x8xf32>
    %45 = vector.shape_cast %37 : vector<8x8xf32> to vector<1x8x8xf32>
    %46 = vector.shape_cast %38 : vector<8x8xf32> to vector<1x8x8xf32>
    %47 = vector.shape_cast %39 : vector<8x8xf32> to vector<1x8x8xf32>
    %48 = vector.shape_cast %40 : vector<8x8xf32> to vector<1x8x8xf32>
    %49 = vector.shape_cast %41 : vector<8x8xf32> to vector<1x8x8xf32>
    %50 = vector.shape_cast %42 : vector<8x8xf32> to vector<1x8x8xf32>
    %51 = tpu.concatenate %43, %44, %45, %46, %47, %48, %49, %50 in 0 : vector<1x8x8xf32>, vector<1x8x8xf32>, vector<1x8x8xf32>, vector<1x8x8xf32>, vector<1x8x8xf32>, vector<1x8x8xf32>, vector<1x8x8xf32>, vector<1x8x8xf32> -> vector<8x8x8xf32>
    %52 = vector.extract_strided_slice %34 {offsets = [0, 32], sizes = [8, 8], strides = [1, 1]} : vector<16x96xf32> to vector<8x8xf32>
    %53 = vector.extract_strided_slice %34 {offsets = [0, 40], sizes = [8, 8], strides = [1, 1]} : vector<16x96xf32> to vector<8x8xf32>
    %54 = vector.extract_strided_slice %34 {offsets = [0, 48], sizes = [8, 8], strides = [1, 1]} : vector<16x96xf32> to vector<8x8xf32>
    %55 = vector.extract_strided_slice %34 {offsets = [0, 56], sizes = [8, 8], strides = [1, 1]} : vector<16x96xf32> to vector<8x8xf32>
    %56 = vector.extract_strided_slice %34 {offsets = [8, 32], sizes = [8, 8], strides = [1, 1]} : vector<16x96xf32> to vector<8x8xf32>
    %57 = vector.extract_strided_slice %34 {offsets = [8, 40], sizes = [8, 8], strides = [1, 1]} : vector<16x96xf32> to vector<8x8xf32>
    %58 = vector.extract_strided_slice %34 {offsets = [8, 48], sizes = [8, 8], strides = [1, 1]} : vector<16x96xf32> to vector<8x8xf32>
    %59 = vector.extract_strided_slice %34 {offsets = [8, 56], sizes = [8, 8], strides = [1, 1]} : vector<16x96xf32> to vector<8x8xf32>
    %60 = vector.shape_cast %52 : vector<8x8xf32> to vector<1x8x8xf32>
    %61 = vector.shape_cast %53 : vector<8x8xf32> to vector<1x8x8xf32>
    %62 = vector.shape_cast %54 : vector<8x8xf32> to vector<1x8x8xf32>
    %63 = vector.shape_cast %55 : vector<8x8xf32> to vector<1x8x8xf32>
    %64 = vector.shape_cast %56 : vector<8x8xf32> to vector<1x8x8xf32>
    %65 = vector.shape_cast %57 : vector<8x8xf32> to vector<1x8x8xf32>
    %66 = vector.shape_cast %58 : vector<8x8xf32> to vector<1x8x8xf32>
    %67 = vector.shape_cast %59 : vector<8x8xf32> to vector<1x8x8xf32>
    %68 = tpu.concatenate %60, %61, %62, %63, %64, %65, %66, %67 in 0 : vector<1x8x8xf32>, vector<1x8x8xf32>, vector<1x8x8xf32>, vector<1x8x8xf32>, vector<1x8x8xf32>, vector<1x8x8xf32>, vector<1x8x8xf32>, vector<1x8x8xf32> -> vector<8x8x8xf32>
    %69 = vector.extract_strided_slice %34 {offsets = [0, 64], sizes = [8, 8], strides = [1, 1]} : vector<16x96xf32> to vector<8x8xf32>
    %70 = vector.extract_strided_slice %34 {offsets = [0, 72], sizes = [8, 8], strides = [1, 1]} : vector<16x96xf32> to vector<8x8xf32>
    %71 = vector.extract_strided_slice %34 {offsets = [0, 80], sizes = [8, 8], strides = [1, 1]} : vector<16x96xf32> to vector<8x8xf32>
    %72 = vector.extract_strided_slice %34 {offsets = [0, 88], sizes = [8, 8], strides = [1, 1]} : vector<16x96xf32> to vector<8x8xf32>
    %73 = vector.extract_strided_slice %34 {offsets = [8, 64], sizes = [8, 8], strides = [1, 1]} : vector<16x96xf32> to vector<8x8xf32>
    %74 = vector.extract_strided_slice %34 {offsets = [8, 72], sizes = [8, 8], strides = [1, 1]} : vector<16x96xf32> to vector<8x8xf32>
    %75 = vector.extract_strided_slice %34 {offsets = [8, 80], sizes = [8, 8], strides = [1, 1]} : vector<16x96xf32> to vector<8x8xf32>
    %76 = vector.extract_strided_slice %34 {offsets = [8, 88], sizes = [8, 8], strides = [1, 1]} : vector<16x96xf32> to vector<8x8xf32>
    %77 = vector.shape_cast %69 : vector<8x8xf32> to vector<1x8x8xf32>
    %78 = vector.shape_cast %70 : vector<8x8xf32> to vector<1x8x8xf32>
    %79 = vector.shape_cast %71 : vector<8x8xf32> to vector<1x8x8xf32>
    %80 = vector.shape_cast %72 : vector<8x8xf32> to vector<1x8x8xf32>
    %81 = vector.shape_cast %73 : vector<8x8xf32> to vector<1x8x8xf32>
    %82 = vector.shape_cast %74 : vector<8x8xf32> to vector<1x8x8xf32>
    %83 = vector.shape_cast %75 : vector<8x8xf32> to vector<1x8x8xf32>
    %84 = vector.shape_cast %76 : vector<8x8xf32> to vector<1x8x8xf32>
    %85 = tpu.concatenate %77, %78, %79, %80, %81, %82, %83, %84 in 0 : vector<1x8x8xf32>, vector<1x8x8xf32>, vector<1x8x8xf32>, vector<1x8x8xf32>, vector<1x8x8xf32>, vector<1x8x8xf32>, vector<1x8x8xf32>, vector<1x8x8xf32> -> vector<8x8x8xf32>
    %cst_14 = arith.constant dense<0.000000e+00> : vector<8x8x8xf32>
    %86 = tpu.matmul %51, %68, %cst_14 {dimension_numbers = #tpu.dot_dimension_numbers<[2], [2], [1], [1], [0, 0, 0, 1, 1, 1], [0], [0]>} : vector<8x8x8xf32>, vector<8x8x8xf32>, vector<8x8x8xf32> -> vector<8x8x8xf32>
    %cst_15 = arith.constant 0.353553385 : f32
    %87 = vector.broadcast %cst_15 : f32 to vector<8x8x8xf32>
    %88 = arith.mulf %86, %87 : vector<8x8x8xf32>
    %89 = tpu.iota {dimensions = array<i32: 0>} : vector<8x8xi32>
    %90 = tpu.iota {dimensions = array<i32: 1>} : vector<8x8xi32>
    %91 = arith.cmpi sge, %89, %90 : vector<8x8xi32>
    %cst_16 = arith.constant 0.000000e+00 : f32
    %cst_17 = arith.constant -1.000000e+30 : f32
    %92 = vector.broadcast %cst_16 : f32 to vector<8x8xf32>
    %93 = vector.broadcast %cst_17 : f32 to vector<8x8xf32>
    %94 = arith.select %91, %92, %93 : vector<8x8xi1>, vector<8x8xf32>
    %95 = vector.shape_cast %94 : vector<8x8xf32> to vector<1x8x8xf32>
    %96 = vector.broadcast %95 : vector<1x8x8xf32> to vector<8x8x8xf32>
    %97 = arith.addf %88, %96 : vector<8x8x8xf32>
    %cst_18 = arith.constant dense<0xFF800000> : vector<8x8xf32>
    %98 = vector.multi_reduction <maximumf>, %97, %cst_18 [2] : vector<8x8x8xf32> to vector<8x8xf32>
    %99 = vector.shape_cast %98 : vector<8x8xf32> to vector<8x8x1xf32>
    %100 = vector.broadcast %99 : vector<8x8x1xf32> to vector<8x8x8xf32>
    %101 = arith.subf %97, %100 : vector<8x8x8xf32>
    %102 = math.exp %101 : vector<8x8x8xf32>
    %cst_19 = arith.constant dense<0.000000e+00> : vector<8x8xf32>
    %103 = vector.multi_reduction <add>, %102, %cst_19 [2] : vector<8x8x8xf32> to vector<8x8xf32>
    %104 = vector.shape_cast %103 : vector<8x8xf32> to vector<8x8x1xf32>
    %105 = tpu.reciprocal %104 {approx = true} : vector<8x8x1xf32> -> vector<8x8x1xf32>
    %106 = vector.broadcast %105 : vector<8x8x1xf32> to vector<8x8x8xf32>
    %107 = arith.mulf %102, %106 : vector<8x8x8xf32>
    %cst_20 = arith.constant dense<0.000000e+00> : vector<8x8x8xf32>
    %108 = tpu.matmul %107, %85, %cst_20 {dimension_numbers = #tpu.dot_dimension_numbers<[2], [1], [1], [2], [0, 0, 0, 1, 1, 2], [0], [0]>} : vector<8x8x8xf32>, vector<8x8x8xf32>, vector<8x8x8xf32> -> vector<8x8x8xf32>
    %109 = vector.extract_strided_slice %108 {offsets = [0, 0, 0], sizes = [1, 8, 8], strides = [1, 1, 1]} : vector<8x8x8xf32> to vector<1x8x8xf32>
    %110 = vector.shape_cast %109 : vector<1x8x8xf32> to vector<8x8xf32>
    %111 = vector.extract_strided_slice %108 {offsets = [1, 0, 0], sizes = [1, 8, 8], strides = [1, 1, 1]} : vector<8x8x8xf32> to vector<1x8x8xf32>
    %112 = vector.shape_cast %111 : vector<1x8x8xf32> to vector<8x8xf32>
    %113 = vector.extract_strided_slice %108 {offsets = [2, 0, 0], sizes = [1, 8, 8], strides = [1, 1, 1]} : vector<8x8x8xf32> to vector<1x8x8xf32>
    %114 = vector.shape_cast %113 : vector<1x8x8xf32> to vector<8x8xf32>
    %115 = vector.extract_strided_slice %108 {offsets = [3, 0, 0], sizes = [1, 8, 8], strides = [1, 1, 1]} : vector<8x8x8xf32> to vector<1x8x8xf32>
    %116 = vector.shape_cast %115 : vector<1x8x8xf32> to vector<8x8xf32>
    %117 = tpu.concatenate %110, %112, %114, %116 in 1 : vector<8x8xf32>, vector<8x8xf32>, vector<8x8xf32>, vector<8x8xf32> -> vector<8x32xf32>
    %118 = vector.extract_strided_slice %108 {offsets = [4, 0, 0], sizes = [1, 8, 8], strides = [1, 1, 1]} : vector<8x8x8xf32> to vector<1x8x8xf32>
    %119 = vector.shape_cast %118 : vector<1x8x8xf32> to vector<8x8xf32>
    %120 = vector.extract_strided_slice %108 {offsets = [5, 0, 0], sizes = [1, 8, 8], strides = [1, 1, 1]} : vector<8x8x8xf32> to vector<1x8x8xf32>
    %121 = vector.shape_cast %120 : vector<1x8x8xf32> to vector<8x8xf32>
    %122 = vector.extract_strided_slice %108 {offsets = [6, 0, 0], sizes = [1, 8, 8], strides = [1, 1, 1]} : vector<8x8x8xf32> to vector<1x8x8xf32>
    %123 = vector.shape_cast %122 : vector<1x8x8xf32> to vector<8x8xf32>
    %124 = vector.extract_strided_slice %108 {offsets = [7, 0, 0], sizes = [1, 8, 8], strides = [1, 1, 1]} : vector<8x8x8xf32> to vector<1x8x8xf32>
    %125 = vector.shape_cast %124 : vector<1x8x8xf32> to vector<8x8xf32>
    %126 = tpu.concatenate %119, %121, %123, %125 in 1 : vector<8x8xf32>, vector<8x8xf32>, vector<8x8xf32>, vector<8x8xf32> -> vector<8x32xf32>
    %127 = tpu.concatenate %117, %126 in 0 : vector<8x32xf32>, vector<8x32xf32> -> vector<16x32xf32>
    %c0_21 = arith.constant 0 : index
    %c0_22 = arith.constant 0 : index
    %128 = vector.load %arg2[%c0_21, %c0_22] : memref<32x32xf32, #tpu.memory_space<vmem>>, vector<32x32xf32>
    %cst_23 = arith.constant dense<0.000000e+00> : vector<16x32xf32>
    %129 = tpu.matmul %127, %128, %cst_23 {dimension_numbers = #tpu.dot_dimension_numbers<[1], [0], [0], [1], [0, 0, 1, 1], [], []>} : vector<16x32xf32>, vector<32x32xf32>, vector<16x32xf32> -> vector<16x32xf32>
    %c4 = arith.constant 4 : index
    %c0_24 = arith.constant 0 : index
    %130 = vector.load %arg5[%c4, %c0_24] : memref<6x32xf32, #tpu.memory_space<vmem>>, vector<1x32xf32>
    %131 = vector.shape_cast %130 : vector<1x32xf32> to vector<32xf32>
    %132 = vector.shape_cast %131 : vector<32xf32> to vector<1x32xf32>
    %133 = vector.broadcast %132 : vector<1x32xf32> to vector<16x32xf32>
    %134 = arith.addf %129, %133 : vector<16x32xf32>
    %135 = arith.addf %1, %134 : vector<16x32xf32>
    %c2 = arith.constant 2 : index
    %c0_25 = arith.constant 0 : index
    %136 = vector.load %arg5[%c2, %c0_25] : memref<6x32xf32, #tpu.memory_space<vmem>>, vector<1x32xf32>
    %137 = vector.shape_cast %136 : vector<1x32xf32> to vector<32xf32>
    %c3 = arith.constant 3 : index
    %c0_26 = arith.constant 0 : index
    %138 = vector.load %arg5[%c3, %c0_26] : memref<6x32xf32, #tpu.memory_space<vmem>>, vector<1x32xf32>
    %139 = vector.shape_cast %138 : vector<1x32xf32> to vector<32xf32>
    %cst_27 = arith.constant dense<0.000000e+00> : vector<16xf32>
    %140 = vector.multi_reduction <add>, %135, %cst_27 [1] : vector<16x32xf32> to vector<16xf32>
    %141 = vector.shape_cast %140 : vector<16xf32> to vector<16x1xf32>
    %cst_28 = arith.constant 3.200000e+01 : f32
    %142 = vector.broadcast %cst_28 : f32 to vector<16x1xf32>
    %143 = arith.divf %141, %142 : vector<16x1xf32>
    %144 = vector.broadcast %143 : vector<16x1xf32> to vector<16x32xf32>
    %145 = arith.subf %135, %144 : vector<16x32xf32>
    %146 = arith.mulf %145, %145 : vector<16x32xf32>
    %cst_29 = arith.constant dense<0.000000e+00> : vector<16xf32>
    %147 = vector.multi_reduction <add>, %146, %cst_29 [1] : vector<16x32xf32> to vector<16xf32>
    %148 = vector.shape_cast %147 : vector<16xf32> to vector<16x1xf32>
    %cst_30 = arith.constant 3.200000e+01 : f32
    %149 = vector.broadcast %cst_30 : f32 to vector<16x1xf32>
    %150 = arith.divf %148, %149 : vector<16x1xf32>
    %151 = vector.broadcast %143 : vector<16x1xf32> to vector<16x32xf32>
    %152 = arith.subf %135, %151 : vector<16x32xf32>
    %cst_31 = arith.constant 9.99999974E-6 : f32
    %153 = vector.broadcast %cst_31 : f32 to vector<16x1xf32>
    %154 = arith.addf %150, %153 : vector<16x1xf32>
    %155 = math.rsqrt %154 : vector<16x1xf32>
    %156 = vector.broadcast %155 : vector<16x1xf32> to vector<16x32xf32>
    %157 = arith.mulf %152, %156 : vector<16x32xf32>
    %158 = vector.shape_cast %137 : vector<32xf32> to vector<1x32xf32>
    %159 = vector.broadcast %158 : vector<1x32xf32> to vector<16x32xf32>
    %160 = arith.mulf %157, %159 : vector<16x32xf32>
    %161 = vector.shape_cast %139 : vector<32xf32> to vector<1x32xf32>
    %162 = vector.broadcast %161 : vector<1x32xf32> to vector<16x32xf32>
    %163 = arith.addf %160, %162 : vector<16x32xf32>
    %c0_32 = arith.constant 0 : index
    %c0_33 = arith.constant 0 : index
    %164 = vector.load %arg3[%c0_32, %c0_33] : memref<32x128xf32, #tpu.memory_space<vmem>>, vector<32x128xf32>
    %cst_34 = arith.constant dense<0.000000e+00> : vector<16x128xf32>
    %165 = tpu.matmul %163, %164, %cst_34 {dimension_numbers = #tpu.dot_dimension_numbers<[1], [0], [0], [1], [0, 0, 1, 1], [], []>} : vector<16x32xf32>, vector<32x128xf32>, vector<16x128xf32> -> vector<16x128xf32>
    %c0_35 = arith.constant 0 : index
    %c0_36 = arith.constant 0 : index
    %166 = vector.load %arg7[%c0_35, %c0_36] : memref<1x128xf32, #tpu.memory_space<vmem>>, vector<1x128xf32>
    %167 = vector.broadcast %166 : vector<1x128xf32> to vector<16x128xf32>
    %168 = arith.addf %165, %167 : vector<16x128xf32>
    %cst_37 = arith.constant 5.000000e-01 : f32
    %169 = vector.broadcast %cst_37 : f32 to vector<16x128xf32>
    %170 = arith.mulf %169, %168 : vector<16x128xf32>
    %cst_38 = arith.constant 4.471500e-02 : f32
    %171 = vector.broadcast %cst_38 : f32 to vector<16x128xf32>
    %172 = arith.mulf %171, %168 : vector<16x128xf32>
    %173 = arith.mulf %172, %168 : vector<16x128xf32>
    %174 = arith.mulf %173, %168 : vector<16x128xf32>
    %175 = arith.addf %168, %174 : vector<16x128xf32>
    %cst_39 = arith.constant 0.797884583 : f32
    %176 = vector.broadcast %cst_39 : f32 to vector<16x128xf32>
    %177 = arith.mulf %176, %175 : vector<16x128xf32>
    %178 = math.tanh %177 : vector<16x128xf32>
    %cst_40 = arith.constant 1.000000e+00 : f32
    %179 = vector.broadcast %cst_40 : f32 to vector<16x128xf32>
    %180 = arith.addf %179, %178 : vector<16x128xf32>
    %181 = arith.mulf %170, %180 : vector<16x128xf32>
    %c0_41 = arith.constant 0 : index
    %c0_42 = arith.constant 0 : index
    %182 = vector.load %arg4[%c0_41, %c0_42] : memref<128x32xf32, #tpu.memory_space<vmem>>, vector<128x32xf32>
    %cst_43 = arith.constant dense<0.000000e+00> : vector<16x32xf32>
    %183 = tpu.matmul %181, %182, %cst_43 {dimension_numbers = #tpu.dot_dimension_numbers<[1], [0], [0], [1], [0, 0, 1, 1], [], []>} : vector<16x128xf32>, vector<128x32xf32>, vector<16x32xf32> -> vector<16x32xf32>
    %184 = arith.addf %135, %183 : vector<16x32xf32>
    %c5 = arith.constant 5 : index
    %c0_44 = arith.constant 0 : index
    %185 = vector.load %arg5[%c5, %c0_44] : memref<6x32xf32, #tpu.memory_space<vmem>>, vector<1x32xf32>
    %186 = vector.shape_cast %185 : vector<1x32xf32> to vector<32xf32>
    %187 = vector.shape_cast %186 : vector<32xf32> to vector<1x32xf32>
    %188 = vector.broadcast %187 : vector<1x32xf32> to vector<16x32xf32>
    %189 = arith.addf %184, %188 : vector<16x32xf32>
    %190 = vector.shape_cast %189 : vector<16x32xf32> to vector<2x8x32xf32>
    %c0_45 = arith.constant 0 : index
    %c0_46 = arith.constant 0 : index
    %c0_47 = arith.constant 0 : index
    %191 = vector.load %arg8[%c0_45, %c0_46, %c0_47] : memref<2x8x32xf32, #tpu.memory_space<vmem>>, vector<2x8x32xf32>
    tpu.vector_store %arg8[%c0_45, %c0_46, %c0_47], %190 {strides = array<i32>} : memref<2x8x32xf32, #tpu.memory_space<vmem>>, vector<2x8x32xf32>,
    return
  }
}

</mosaic_0001>

<bundles_post_ra>
// kernel: tpu_custom_call.1
= control target key start
LH: loop header
LB: loop body
LE: loop exit
PB: predicated region body
PF: predicated region fallthrough
CT: control target
= control target key end

     0   :  { %vm34_vm0 = vcmask 261120   ;;  %s2669_s0 = inlined_call_operand.vmem [shape: f32[2,8,32], index: 0, kind: input, shape index: {}]   ;;  %s2670_s1 = inlined_call_operand.vmem [shape: f32[32,96], index: 1, kind: input, shape index: {}]   ;;  %s2671_s2 = inlined_call_operand.vmem [shape: f32[32,32], index: 2, kind: input, shape index: {}]   ;;  %s2672_s3 = inlined_call_operand.vmem [shape: f32[32,128], index: 3, kind: input, shape index: {}]   ;;  %s2673_s4 = inlined_call_operand.vmem [shape: f32[128,32], index: 4, kind: input, shape index: {}]   ;;  %s2674_s5 = inlined_call_operand.vmem [shape: f32[6,32], index: 5, kind: input, shape index: {}]   ;;  %s2675_s6 = inlined_call_operand.vmem [shape: f32[1,96], index: 6, kind: input, shape index: {}]   ;;  %s2676_s7 = inlined_call_operand.vmem [shape: f32[1,128], index: 7, kind: input, shape index: {}]   ;;  %s2677_s8 = inlined_call_operand.hbm [shape: f32[2,8,32], index: 8, kind: output, shape index: {}]  }
   0x1   :  { %v2351_v0 = vld [vmem:[%s2669_s0] sm:$0xff]  ;;  %v2356_v1 = vld [vmem:[%s2669_s0 + $0x8] sm:$0xff] }
   0x2   :  { %13 = vsyncpa [#allocation3], 0  ;;  %v35_v2 = vsel %vm34_vm0, %v2351_v0, 0.0  ;;  %v38_v3 = vsel %vm34_vm0, %v2356_v1, 0.0  ;;  %v74_v14 = vld [vmem:[%s2670_s1] sm:$0xff]  ;;  %v75_v15 = vld [vmem:[%s2670_s1 + $0x8] sm:$0xff]  ;;  %v797_v56 = vlaneseq }
   0x3   :  { %36 = vadd.xlane.f32.xlu0 %v35_v2  ;;  %v76_v16 = vld [vmem:[%s2670_s1 + $0x10] sm:$0xff]  ;;  %v2153_v17 = vpack.c.bf16 %v75_v15, %v74_v14  ;;  %v77_v18 = vld [vmem:[%s2670_s1 + $0x18] sm:$0xff]  ;;  %v1899_v27 = vld [vmem:[%s2674_s5] ss:$0 sm:$0xff]  ;;  %v2290_v36 = vmov 0.0   ;;  %vm2291_vm1 = vmmov 0  }
   0x4   :  { %v2157_v19 = vpack.c.bf16 %v77_v18, %v76_v16  ;;  %v1900_v29 = vld [vmem:[%s2674_s5 + $0x1] ss:$0 sm:$0xff]  ;;  %2026 = vmatprep.subr.mxu0 %v2290_v36  ;;  %v1901_v37 = vld [vmem:[%s2675_s6] ss:$0 sm:$0xff]  ;;  %2028 = vmatprep.mubr.msk.f32.mxu0 %vm2291_vm1, %v2290_v36  ;;  %s2292_s21 = smov 112   ;;  %s2293_s22 = smov 120  }
   0x5   :  { %2154 = vmatprep.subr.bf16.mxu1 %v2153_v17  ;;  %s2294_s6 = smov 104   ;;  %s2295_s23 = smov 96   ;;  %vm182_vm2 = vcmask 64512   ;;  %v798_v57 = vshrl.u32 %v797_v56, 7  ;;  %v800_v58 = vand.u32 127, %v797_v56  ;;  %vm1520_vm4 = vcmask 130048  }
   0x6   :  { %2156 = vmatpush3.bf16.msra.mxu1 %v2153_v17  ;;  %v2296_v60 = vmov -1e+30   ;;  %s2297_s24 = smov 64   ;;  %s2298_s10 = smov 8   ;;  %vm1522_vm5 = vcmask 195584  }
   0x7   :  { %39 = vadd.xlane.f32.xlu0 %v38_v3  ;;  %2158 = vmatprep.subr.bf16.mxu1 %v2157_v19  ;;  %vm801_vm3 = vcmp.ge.s32.totalorder %v798_v57, %v800_v58  ;;  %s2299_s11 = smov 16   ;;  %s2300_s12 = smov 24  }
   0x8   :  { %v802_v61 = vsel %vm801_vm3, 0.0, %v2296_v60  ;;  %s2301_s0 = smov [#allocation2]  }
   0x9   :  { %s1888_s9 = sshll.u32 %s2301_s0, 4  ;;  %s1889_s9 = int_to_ptr.vmem [resolvable:$true] %s1888_s9 }
   0xa   :  { %2160 = vmatpush3.bf16.msra.mxu1 %v2157_v19  ;;  %p2271_p1 = scmp.lt.s32.totalorder %s1889_s9, %s1889_s9 }
   0xb   :  { %2016 = vmatprep.subr.mxu1 %v2290_v36 }
  0x90   :  { %v37_v4 = vpop.xlane.xlu0 %36 }
  0x91   :  { %v42_v5 = vmul.f32 0.03125, %v37_v4 }
  0x93   :  { %v44_v6 = vsub.f32 %v2351_v0, %v42_v5 }
  0x94   :  { %v40_v7 = vpop.xlane.xlu0 %39 }
  0x95   :  { %v43_v8 = vmul.f32 0.03125, %v40_v7  ;;  %v46_v9 = vmul.f32 %v44_v6, %v44_v6 }
  0x97   :  { %v45_v10 = vsub.f32 %v2356_v1, %v43_v8  ;;  %v48_v11 = vsel %vm34_vm0, %v46_v9, 0.0 }
  0x98   :  { %49 = vadd.xlane.f32.xlu1 %v48_v11 }
  0x99   :  { %v47_v12 = vmul.f32 %v45_v10, %v45_v10 }
  0x9b   :  { %v51_v13 = vsel %vm34_vm0, %v47_v12, 0.0 }
  0x9c   :  { %52 = vadd.xlane.f32.xlu1 %v51_v13 }
 0x125   :  { %v50_v20 = vpop.xlane.xlu1 %49 }
 0x126   :  { %v54_v21 = vmul.f32 0.03125, %v50_v20 }
 0x128   :  { %v56_v22 = vadd.f32 1e-05, %v54_v21 }
 0x129   :  { %v53_v23 = vpop.xlane.xlu1 %52 }
 0x12a   :  { %2222 = vrsqrt.f32 %v56_v22  ;;  %v55_v24 = vmul.f32 0.03125, %v53_v23 }
 0x12c   :  { %v57_v25 = vadd.f32 1e-05, %v55_v24 }
 0x12e   :  { %2224 = vrsqrt.f32 %v57_v25 }
 0x134   :  { %v2223_v26 = vpop.eup %2222 }
 0x135   :  { %v60_v28 = vmul.f32 %v2223_v26, %v44_v6 }
 0x137   :  { %v66_v30 = vmul.f32 %v1899_v27, %v60_v28 }
 0x138   :  { %v2225_v31 = vpop.eup %2224 }
 0x139   :  { %v61_v32 = vmul.f32 %v2225_v31, %v45_v10  ;;  %v72_v33 = vadd.f32 %v1900_v29, %v66_v30 }
 0x13b   :  { %v67_v34 = vmul.f32 %v1899_v27, %v61_v32  ;;  %2013 = vmatprep.mubr.msk.f32.mxu1 %vm34_vm0, %v72_v33 }
 0x13d   :  { %v73_v35 = vadd.f32 %v1900_v29, %v67_v34 }
 0x13f   :  { %2014 = vmatmul.mubr.msk.f32.vlgmr.msra.gmra.mrb[0].mxu1 %vm34_vm0, %v73_v35 }
 0x140   :  { %2018 = vmatprep.mubr.msk.f32.mxu1 %vm2291_vm1, %v2290_v36 }
 0x212   :  { %v2015_v38 = vpop.f32.mrb[0].mxu1 }
 0x213   :  { %v157_v39 = vpop.f32.mrb[1].mxu1  ;;  %v2399_v41 = vadd.f32 %v2015_v38, %v1901_v37 }
 0x214   :  { %v2395_v40 = vadd.f32 %v1901_v37, %v157_v39 }
 0x216   :  { %169 = vrot.lane.b32.xlu1 %v2395_v40, %s2292_s21  ;;  %167 = vrot.lane.b32.xlu0 %v2395_v40, %s2293_s22 }
 0x21a   :  { %171 = vrot.lane.b32.xlu1 %v2395_v40, %s2294_s6  ;;  %176 = vrot.lane.b32.xlu0 %v2399_v41, %s2292_s21 }
 0x21e   :  { %174 = vrot.lane.b32.xlu1 %v2399_v41, %s2293_s22  ;;  %180 = vrot.lane.b32.xlu0 %v2395_v40, %s2295_s23 }
 0x222   :  { %178 = vrot.lane.b32.xlu1 %v2399_v41, %s2294_s6 }
 0x288   :  { %v2406_v42 = vpop.permute.xlu1 %169  ;;  %v2408_v43 = vpop.permute.xlu0 %167 }
 0x289   :  { %333 = vrot.lane.b32.xlu0 %v2406_v42, %s2295_s23  ;;  %257 = vrot.lane.b32.xlu1 %v2408_v43, %s2295_s23 }
 0x28c   :  { %v2412_v44 = vpop.permute.xlu1 %171  ;;  %v2414_v45 = vpop.permute.xlu0 %176 }
 0x28d   :  { %485 = vrot.lane.b32.xlu0 %v2399_v41, %s2295_s23  ;;  %409 = vrot.lane.b32.xlu1 %v2412_v44, %s2295_s23 }
 0x290   :  { %v2418_v46 = vpop.permute.xlu1 %174  ;;  %v181_v47 = vpop.permute.xlu0 %180 }
 0x291   :  { %561 = vrot.lane.b32.xlu1 %v2418_v46, %s2295_s23  ;;  %637 = vrot.lane.b32.xlu0 %v2414_v45, %s2295_s23 }
 0x292   :  { %2017 = vmatpush3.xpose.msk.msra.mxu1 %vm182_vm2, %v181_v47 }
 0x293   :  { %2021 = vmatprep.subr.mxu1 %v2290_v36 }
 0x294   :  { %v2424_v48 = vpop.permute.xlu1 %178 }
 0x295   :  { %2019 = vmatmul.mubr.msk.f32.vlgmr.msra.gmra.mrb[2].mxu1 %vm182_vm2, %v2395_v40  ;;  %713 = vrot.lane.b32.xlu1 %v2424_v48, %s2295_s23 }
 0x296   :  { %2023 = vmatprep.mubr.msk.f32.mxu1 %vm2291_vm1, %v2290_v36 }
 0x2fb   :  { %v258_v49 = vpop.permute.xlu1 %257  ;;  %v334_v50 = vpop.permute.xlu0 %333 }
 0x2fc   :  { %2022 = vmatpush3.xpose.msk.msra.mxu1 %vm182_vm2, %v258_v49  ;;  %2027 = vmatpush3.xpose.msk.msra.mxu0 %vm182_vm2, %v334_v50 }
 0x2fd   :  { %2031 = vmatprep.subr.mxu1 %v2290_v36  ;;  %2036 = vmatprep.subr.mxu0 %v2290_v36 }
 0x2ff   :  { %v410_v51 = vpop.permute.xlu1 %409  ;;  %2024 = vmatmul.mubr.msk.f32.vlgmr.msra.gmra.mrb[4].mxu1 %vm182_vm2, %v2408_v43  ;;  %2029 = vmatmul.mubr.msk.f32.vlgmr.msra.gmra.mrb[0].mxu0 %vm182_vm2, %v2406_v42  ;;  %v486_v52 = vpop.permute.xlu0 %485 }
 0x300   :  { %2032 = vmatpush3.xpose.msk.msra.mxu1 %vm182_vm2, %v410_v51  ;;  %2037 = vmatpush3.xpose.msk.msra.mxu0 %vm182_vm2, %v486_v52 }
 0x301   :  { %2033 = vmatprep.mubr.msk.f32.mxu1 %vm2291_vm1, %v2290_v36  ;;  %2038 = vmatprep.mubr.msk.f32.mxu0 %vm2291_vm1, %v2290_v36 }
 0x302   :  { %2041 = vmatprep.subr.mxu1 %v2290_v36  ;;  %2046 = vmatprep.subr.mxu0 %v2290_v36 }
 0x303   :  { %v562_v53 = vpop.permute.xlu1 %561  ;;  %2034 = vmatmul.mubr.msk.f32.vlgmr.msra.gmra.mrb[6].mxu1 %vm182_vm2, %v2412_v44  ;;  %2039 = vmatmul.mubr.msk.f32.vlgmr.msra.gmra.mrb[2].mxu0 %vm182_vm2, %v2399_v41  ;;  %v638_v54 = vpop.permute.xlu0 %637 }
 0x304   :  { %2042 = vmatpush3.xpose.msk.msra.mxu1 %vm182_vm2, %v562_v53  ;;  %2047 = vmatpush3.xpose.msk.msra.mxu0 %vm182_vm2, %v638_v54 }
 0x305   :  { %2043 = vmatprep.mubr.msk.f32.mxu1 %vm2291_vm1, %v2290_v36  ;;  %2048 = vmatprep.mubr.msk.f32.mxu0 %vm2291_vm1, %v2290_v36 }
 0x306   :  { %2051 = vmatprep.subr.mxu1 %v2290_v36  ;;  %2056 = vmatprep.subr.mxu0 %v2290_v36 }
 0x307   :  { %v714_v55 = vpop.permute.xlu1 %713  ;;  %2044 = vmatmul.mubr.msk.f32.vlgmr.msra.gmra.mrb[8].mxu1 %vm182_vm2, %v2418_v46  ;;  %2049 = vmatmul.mubr.msk.f32.vlgmr.msra.gmra.mrb[4].mxu0 %vm182_vm2, %v2414_v45 }
 0x308   :  { %2052 = vmatpush3.xpose.msk.msra.mxu1 %vm182_vm2, %v714_v55  ;;  %2053 = vmatprep.mubr.msk.f32.mxu1 %vm2291_vm1, %v2290_v36 }
 0x309   :  { %2061 = vmatprep.subr.mxu1 %v2290_v36  ;;  %2058 = vmatprep.mubr.msk.f32.mxu0 %vm2291_vm1, %v2290_v36 }
 0x30b   :  { %2054 = vmatmul.mubr.msk.f32.vlgmr.msra.gmra.mrb[10].mxu1 %vm182_vm2, %v2424_v48 }
 0x30c   :  { %2063 = vmatprep.mubr.msk.f32.mxu1 %vm2291_vm1, %v2290_v36 }
 0x368   :  { %v253_v59 = vpop.f32.mrb[2].mxu1 }
 0x369   :  { %v789_v62 = vmul.f32 0.35355338, %v253_v59  ;;  %v2020_v63 = vpop.f32.mrb[3].mxu1 }
 0x36b   :  { %v803_v2 = vadd.f32 %v802_v61, %v789_v62 }
 0x36d   :  { %v811_v3 = vsel %vm182_vm2, %v803_v2, -inf }
 0x36e   :  { %812 = vmax.xlane.f32.xlu0 %v811_v3 }
 0x3d2   :  { %v329_v4 = vpop.f32.mrb[4].mxu1  ;;  %v405_v5 = vpop.f32.mrb[0].mxu0 }
 0x3d3   :  { %v790_v6 = vmul.f32 0.35355338, %v329_v4  ;;  %v791_v7 = vmul.f32 0.35355338, %v405_v5  ;;  %v2025_v8 = vpop.f32.mrb[5].mxu1  ;;  %v2030_v9 = vpop.f32.mrb[1].mxu0 }
 0x3d5   :  { %v804_v10 = vadd.f32 %v802_v61, %v790_v6  ;;  %v805_v11 = vadd.f32 %v802_v61, %v791_v7 }
 0x3d6   :  { %v481_v12 = vpop.f32.mrb[6].mxu1  ;;  %v557_v13 = vpop.f32.mrb[2].mxu0 }
 0x3d7   :  { %v792_v14 = vmul.f32 0.35355338, %v481_v12  ;;  %v2035_v15 = vpop.f32.mrb[7].mxu1  ;;  %v2040_v16 = vpop.f32.mrb[3].mxu0  ;;  %v793_v17 = vmul.f32 0.35355338, %v557_v13 }
 0x3d8   :  { %v814_v18 = vsel %vm182_vm2, %v804_v10, -inf  ;;  %v817_v19 = vsel %vm182_vm2, %v805_v11, -inf }
 0x3d9   :  { %815 = vmax.xlane.f32.xlu1 %v814_v18  ;;  %818 = vmax.xlane.f32.xlu0 %v817_v19  ;;  %v806_v20 = vadd.f32 %v802_v61, %v792_v14  ;;  %v807_v28 = vadd.f32 %v802_v61, %v793_v17 }
 0x3da   :  { %v633_v21 = vpop.f32.mrb[8].mxu1  ;;  %v709_v22 = vpop.f32.mrb[4].mxu0 }
 0x3db   :  { %v794_v23 = vmul.f32 0.35355338, %v633_v21  ;;  %v2045_v24 = vpop.f32.mrb[9].mxu1  ;;  %v2050_v25 = vpop.f32.mrb[5].mxu0  ;;  %v795_v26 = vmul.f32 0.35355338, %v709_v22 }
 0x3dc   :  { %v820_v27 = vsel %vm182_vm2, %v806_v20, -inf  ;;  %v823_v34 = vsel %vm182_vm2, %v807_v28, -inf }
 0x3dd   :  { %821 = vmax.xlane.f32.xlu0 %v820_v27  ;;  %v808_v29 = vadd.f32 %v802_v61, %v794_v23  ;;  %v809_v35 = vadd.f32 %v802_v61, %v795_v26 }
 0x3de   :  { %v785_v30 = vpop.f32.mrb[10].mxu1 }
 0x3df   :  { %v796_v31 = vmul.f32 0.35355338, %v785_v30  ;;  %v2055_v32 = vpop.f32.mrb[11].mxu1  ;;  %v826_v33 = vsel %vm182_vm2, %v808_v29, -inf  ;;  %v829_v39 = vsel %vm182_vm2, %v809_v35, -inf }
 0x3e0   :  { %827 = vmax.xlane.f32.xlu1 %v826_v33 }
 0x3e1   :  { %824 = vmax.xlane.f32.xlu0 %v823_v34  ;;  %v810_v37 = vadd.f32 %v802_v61, %v796_v31 }
 0x3e3   :  { %v832_v38 = vsel %vm182_vm2, %v810_v37, -inf }
 0x3e4   :  { %833 = vmax.xlane.f32.xlu1 %v832_v38 }
 0x3e5   :  { %830 = vmax.xlane.f32.xlu0 %v829_v39 }
 0x3f5   :  { %975 = vrot.lane.b32.xlu1 %v2408_v43, %s2297_s24 }
 0x3f9   :  { %1051 = vrot.lane.b32.xlu1 %v2406_v42, %s2297_s24 }
 0x3fb   :  { %899 = vrot.lane.b32.xlu0 %v2395_v40, %s2297_s24  ;;  %v813_v47 = vpop.xlane.xlu0 %812 }
 0x3fc   :  { %v835_v49 = vsub.f32 %v803_v2, %v813_v47 }
 0x3fd   :  { %1127 = vrot.lane.b32.xlu1 %v2412_v44, %s2297_s24 }
 0x3fe   :  { %v843_v50 = vmul.f32 1.442695, %v835_v49 }
 0x3ff   :  { %1203 = vrot.lane.b32.xlu0 %v2399_v41, %s2297_s24 }
 0x400   :  { %2226 = vpow2.f32 %v843_v50 }
 0x401   :  { %1279 = vrot.lane.b32.xlu1 %v2418_v46, %s2297_s24 }
 0x40a   :  { %v2493_v43 = vpop.eup %2226 }
 0x40b   :  { %v859_v42 = vsel %vm182_vm2, %v2493_v43, 0.0 }
 0x41e   :  { %860 = vadd.xlane.f32.xlu0 %v859_v42 }
 0x466   :  { %v816_v40 = vpop.xlane.xlu1 %815  ;;  %v819_v51 = vpop.xlane.xlu0 %818 }
 0x467   :  { %v836_v52 = vsub.f32 %v804_v10, %v816_v40  ;;  %v837_v44 = vsub.f32 %v805_v11, %v819_v51 }
 0x469   :  { %v845_v53 = vmul.f32 1.442695, %v836_v52  ;;  %v847_v54 = vmul.f32 1.442695, %v837_v44 }
 0x46a   :  { %v822_v41 = vpop.xlane.xlu0 %821 }
 0x46b   :  { %2228 = vpow2.f32 %v845_v53  ;;  %v838_v55 = vsub.f32 %v806_v20, %v822_v41 }
 0x46c   :  { %2230 = vpow2.f32 %v847_v54 }
 0x46d   :  { %v849_v46 = vmul.f32 1.442695, %v838_v55  ;;  %v828_v56 = vpop.xlane.xlu1 %827 }
 0x46e   :  { %v840_v57 = vsub.f32 %v808_v29, %v828_v56  ;;  %v825_v58 = vpop.xlane.xlu0 %824  ;;  %v1540_v56 = vld [vmem:[%s2671_s2 + $0x8] sm:$0xff] }
 0x46f   :  { %2232 = vpow2.f32 %v849_v46  ;;  %v839_v59 = vsub.f32 %v807_v28, %v825_v58  ;;  %v1539_v46 = vld [vmem:[%s2671_s2] sm:$0xff]  ;;  %v1542_v58 = vld [vmem:[%s2671_s2 + $0x18] sm:$0xff] }
 0x470   :  { %v853_v60 = vmul.f32 1.442695, %v840_v57  ;;  %v2161_v57 = vpack.c.bf16 %v1540_v56, %v1539_v46 }
 0x471   :  { %v851_v61 = vmul.f32 1.442695, %v839_v59  ;;  %v834_v62 = vpop.xlane.xlu1 %833 }
 0x472   :  { %2234 = vpow2.f32 %v853_v60  ;;  %v842_v63 = vsub.f32 %v810_v37, %v834_v62  ;;  %v831_v2 = vpop.xlane.xlu0 %830 }
 0x473   :  { %2236 = vpow2.f32 %v851_v61  ;;  %v841_v3 = vsub.f32 %v809_v35, %v831_v2 }
 0x474   :  { %v857_v4 = vmul.f32 1.442695, %v842_v63 }
 0x475   :  { %v2229_v5 = vpop.eup %2228  ;;  %v855_v6 = vmul.f32 1.442695, %v841_v3  ;;  %v976_v7 = vpop.permute.xlu1 %975 }
 0x476   :  { %v2231_v8 = vpop.eup %2230  ;;  %2238 = vpow2.f32 %v857_v4  ;;  %v900_v9 = vpop.permute.xlu0 %899  ;;  %v862_v10 = vsel %vm182_vm2, %v2229_v5, 0.0  ;;  %2062 = vmatpush3.msra.mxu1 %v976_v7 }
 0x477   :  { %2240 = vpow2.f32 %v855_v6  ;;  %863 = vadd.xlane.f32.xlu1 %v862_v10  ;;  %v865_v11 = vsel %vm182_vm2, %v2231_v8, 0.0  ;;  %2057 = vmatpush3.msra.mxu0 %v900_v9 }
 0x478   :  { %866 = vadd.xlane.f32.xlu0 %v865_v11  ;;  %2066 = vmatprep.subr.mxu0 %v2290_v36 }
 0x479   :  { %v2233_v12 = vpop.eup %2232  ;;  %2071 = vmatprep.subr.mxu1 %v2290_v36  ;;  %v1052_v26 = vpop.permute.xlu1 %1051 }
 0x47a   :  { %v868_v13 = vsel %vm182_vm2, %v2233_v12, 0.0  ;;  %v1204_v22 = vpop.permute.xlu0 %1203 }
 0x47b   :  { %869 = vadd.xlane.f32.xlu1 %v868_v13 }
 0x47c   :  { %v2235_v14 = vpop.eup %2234 }
 0x47d   :  { %v2237_v15 = vpop.eup %2236  ;;  %v874_v16 = vsel %vm182_vm2, %v2235_v14, 0.0  ;;  %v1128_v27 = vpop.permute.xlu1 %1127 }
 0x47e   :  { %v871_v17 = vsel %vm182_vm2, %v2237_v15, 0.0 }
 0x47f   :  { %875 = vadd.xlane.f32.xlu1 %v874_v16  ;;  %872 = vadd.xlane.f32.xlu0 %v871_v17 }
 0x480   :  { %v2504_v18 = vpop.eup %2238 }
 0x481   :  { %v2506_v19 = vpop.eup %2240  ;;  %v880_v20 = vsel %vm182_vm2, %v2504_v18, 0.0 }
 0x482   :  { %v877_v21 = vsel %vm182_vm2, %v2506_v19, 0.0 }
 0x483   :  { %881 = vadd.xlane.f32.xlu1 %v880_v20  ;;  %878 = vadd.xlane.f32.xlu0 %v877_v21 }
 0x494   :  { %1431 = vrot.lane.b32.xlu1 %v2424_v48, %s2297_s24  ;;  %v1280_v48 = vpop.permute.xlu1 %1279 }
 0x499   :  { %1355 = vrot.lane.b32.xlu0 %v2414_v45, %s2297_s24 }
 0x4ab   :  { %v861_v23 = vpop.xlane.xlu0 %860 }
 0x4ac   :  { %2242 = vrcp.f32 %v861_v23 }
 0x4b6   :  { %v2243_v24 = vpop.eup %2242 }
 0x4b7   :  { %v891_v25 = vmul.f32 %v2243_v24, %v2493_v43  ;;  %v1928_v24 = vld [vmem:[%s2674_s5 + $0x4] ss:$0 sm:$0xff] }
 0x4b9   :  { %2059 = vmatmul.mubr.msk.f32.vlgmr.msra.gmra.mrb[6].mxu0 %vm182_vm2, %v891_v25 }
 0x4ba   :  { %2067 = vmatpush3.msra.mxu0 %v1052_v26  ;;  %2068 = vmatprep.mubr.msk.f32.mxu0 %vm2291_vm1, %v2290_v36 }
 0x4bb   :  { %2076 = vmatprep.subr.mxu0 %v2290_v36 }
 0x504   :  { %v864_v28 = vpop.xlane.xlu1 %863 }
 0x505   :  { %2244 = vrcp.f32 %v864_v28  ;;  %v867_v45 = vpop.xlane.xlu0 %866 }
 0x506   :  { %2246 = vrcp.f32 %v867_v45 }
 0x508   :  { %v870_v29 = vpop.xlane.xlu1 %869 }
 0x509   :  { %2248 = vrcp.f32 %v870_v29 }
 0x50c   :  { %v876_v30 = vpop.xlane.xlu1 %875  ;;  %v873_v31 = vpop.xlane.xlu0 %872 }
 0x50d   :  { %2250 = vrcp.f32 %v876_v30 }
 0x50e   :  { %2252 = vrcp.f32 %v873_v31 }
 0x50f   :  { %v2245_v32 = vpop.eup %2244 }
 0x510   :  { %v2247_v33 = vpop.eup %2246  ;;  %v892_v34 = vmul.f32 %v2245_v32, %v2229_v5  ;;  %v882_v35 = vpop.xlane.xlu1 %881 }
 0x511   :  { %v879_v37 = vpop.xlane.xlu0 %878  ;;  %v893_v38 = vmul.f32 %v2247_v33, %v2231_v8  ;;  %2254 = vrcp.f32 %v882_v35 }
 0x512   :  { %2256 = vrcp.f32 %v879_v37  ;;  %2064 = vmatmul.mubr.msk.f32.vlgmr.msra.gmra.mrb[12].mxu1 %vm182_vm2, %v892_v34 }
 0x513   :  { %v2249_v39 = vpop.eup %2248  ;;  %2069 = vmatmul.mubr.msk.f32.vlgmr.msra.gmra.mrb[8].mxu0 %vm182_vm2, %v893_v38  ;;  %2072 = vmatpush3.msra.mxu1 %v1128_v27 }
 0x514   :  { %v894_v47 = vmul.f32 %v2249_v39, %v2233_v12  ;;  %2077 = vmatpush3.msra.mxu0 %v1204_v22  ;;  %2073 = vmatprep.mubr.msk.f32.mxu1 %vm2291_vm1, %v2290_v36  ;;  %v1432_v40 = vpop.permute.xlu1 %1431 }
 0x515   :  { %2081 = vmatprep.subr.mxu1 %v2290_v36  ;;  %2078 = vmatprep.mubr.msk.f32.mxu0 %vm2291_vm1, %v2290_v36  ;;  %v1356_v52 = vpop.permute.xlu0 %1355 }
 0x516   :  { %2074 = vmatmul.mubr.msk.f32.vlgmr.msra.gmra.mrb[14].mxu1 %vm182_vm2, %v894_v47  ;;  %2086 = vmatprep.subr.mxu0 %v2290_v36  ;;  %v1671_v47 = vld [vmem:[%s2672_s3] sm:$0xff] }
 0x517   :  { %v2251_v49 = vpop.eup %2250  ;;  %2082 = vmatpush3.msra.mxu1 %v1280_v48  ;;  %2083 = vmatprep.mubr.msk.f32.mxu1 %vm2291_vm1, %v2290_v36 }
 0x518   :  { %v2253_v50 = vpop.eup %2252  ;;  %v896_v43 = vmul.f32 %v2251_v49, %v2235_v14  ;;  %2091 = vmatprep.subr.mxu1 %v2290_v36  ;;  %v1672_v49 = vld [vmem:[%s2672_s3 + $0x8] sm:$0xff] }
 0x519   :  { %v895_v42 = vmul.f32 %v2253_v50, %v2237_v15  ;;  %v2169_v50 = vpack.c.bf16 %v1672_v49, %v1671_v47 }
 0x51a   :  { %2084 = vmatmul.mubr.msk.f32.vlgmr.msra.gmra.mrb[16].mxu1 %vm182_vm2, %v896_v43  ;;  %v1673_v43 = vld [vmem:[%s2672_s3 + $0x10] sm:$0xff] }
 0x51b   :  { %v2255_v51 = vpop.eup %2254  ;;  %2079 = vmatmul.mubr.msk.f32.vlgmr.msra.gmra.mrb[10].mxu0 %vm182_vm2, %v895_v42  ;;  %2092 = vmatpush3.msra.mxu1 %v1432_v40  ;;  %v1674_v42 = vld [vmem:[%s2672_s3 + $0x18] sm:$0xff] }
 0x51c   :  { %v2257_v44 = vpop.eup %2256  ;;  %v898_v53 = vmul.f32 %v2255_v51, %v2504_v18  ;;  %2087 = vmatpush3.msra.mxu0 %v1356_v52  ;;  %2088 = vmatprep.mubr.msk.f32.mxu0 %vm2291_vm1, %v2290_v36  ;;  %v2173_v40 = vpack.c.bf16 %v1674_v42, %v1673_v43  ;;  %v1781_v51 = vld [vmem:[%s2673_s4] sm:$0xff]  ;;  %v1782_v52 = vld [vmem:[%s2673_s4 + $0x8] sm:$0xff] }
 0x51d   :  { %v897_v54 = vmul.f32 %v2257_v44, %v2506_v19  ;;  %2093 = vmatprep.mubr.msk.f32.mxu1 %vm2291_vm1, %v2290_v36  ;;  %2162 = vmatprep.subr.bf16.mxu1 %v2161_v57  ;;  %v1541_v36 = vld [vmem:[%s2671_s2 + $0x10] sm:$0xff]  ;;  %v2177_v44 = vpack.c.bf16 %v1782_v52, %v1781_v51 }
 0x51e   :  { %2094 = vmatmul.mubr.msk.f32.vlgmr.msra.gmra.mrb[18].mxu1 %vm182_vm2, %v898_v53  ;;  %v2165_v59 = vpack.c.bf16 %v1542_v58, %v1541_v36  ;;  %v1931_v36 = vld [vmem:[%s2674_s5 + $0x2] ss:$0 sm:$0xff] }
 0x51f   :  { %2089 = vmatmul.mubr.msk.f32.vlgmr.msra.gmra.mrb[12].mxu0 %vm182_vm2, %v897_v54  ;;  %2164 = vmatpush3.bf16.msra.mxu1 %v2161_v57 }
 0x520   :  { %2166 = vmatprep.subr.bf16.mxu1 %v2165_v59  ;;  %2178 = vmatprep.subr.bf16.mxu0 %v2177_v44 }
 0x521   :  { %2180 = vmatpush3.bf16.msra.mxu0 %v2177_v44  ;;  %v1936_v44 = vld [vmem:[%s2674_s5 + $0x5] ss:$0 sm:$0xff] }
 0x523   :  { %2168 = vmatpush3.bf16.msra.mxu1 %v2165_v59  ;;  %v1932_v59 = vld [vmem:[%s2674_s5 + $0x3] ss:$0 sm:$0xff] }
 0x524   :  { %2170 = vmatprep.subr.bf16.mxu1 %v2169_v50 }
 0x58c   :  { %v971_v41 = vpop.f32.mrb[6].mxu0 }
 0x58d   :  { %v2060_v55 = vpop.f32.mrb[7].mxu0 }
 0x5e5   :  { %v1047_v60 = vpop.f32.mrb[12].mxu1 }
 0x5e6   :  { %v1123_v61 = vpop.f32.mrb[8].mxu0  ;;  %v2065_v62 = vpop.f32.mrb[13].mxu1  ;;  %1508 = vrot.lane.b32.xlu0 %v1047_v60, %s2298_s10 }
 0x5e7   :  { %1512 = vrot.lane.b32.xlu1 %v1123_v61, %s2299_s11  ;;  %v2070_v63 = vpop.f32.mrb[9].mxu0 }
 0x5e9   :  { %v1199_v2 = vpop.f32.mrb[14].mxu1 }
 0x5ea   :  { %v2075_v3 = vpop.f32.mrb[15].mxu1 }
 0x5eb   :  { %1516 = vrot.lane.b32.xlu1 %v1199_v2, %s2300_s12 }
 0x5ed   :  { %v1351_v4 = vpop.f32.mrb[16].mxu1 }
 0x5ee   :  { %v1275_v5 = vpop.f32.mrb[10].mxu0  ;;  %v2085_v6 = vpop.f32.mrb[17].mxu1  ;;  %1525 = vrot.lane.b32.xlu0 %v1351_v4, %s2298_s10  ;;  %v1783_v4 = vld [vmem:[%s2673_s4 + $0x10] sm:$0xff] }
 0x5ef   :  { %v2080_v7 = vpop.f32.mrb[11].mxu0 }
 0x5f0   :  { %v1785_v7 = vld [vmem:[%s2673_s4 + $0x20] sm:$0xff] }
 0x5f1   :  { %v1503_v8 = vpop.f32.mrb[18].mxu1 }
 0x5f2   :  { %v1427_v9 = vpop.f32.mrb[12].mxu0  ;;  %v2095_v10 = vpop.f32.mrb[19].mxu1  ;;  %1533 = vrot.lane.b32.xlu1 %v1503_v8, %s2300_s12  ;;  %v1786_v8 = vld [vmem:[%s2673_s4 + $0x28] sm:$0xff] }
 0x5f3   :  { %1529 = vrot.lane.b32.xlu0 %v1427_v9, %s2299_s11  ;;  %v2090_v11 = vpop.f32.mrb[13].mxu0  ;;  %v2185_v9 = vpack.c.bf16 %v1786_v8, %v1785_v7  ;;  %v1787_v10 = vld [vmem:[%s2673_s4 + $0x30] sm:$0xff]  ;;  %s2266_s11 = scalar_lea.vmem %s1889_s9, 256 }
 0x5f4   :  { %v1788_v11 = vld [vmem:[%s2673_s4 + $0x38] sm:$0xff]  ;;  %p2267_p0 = scmp.ne.s32.totalorder %s1889_s9, %s2266_s11  ;;  %p2272_p2 = scmp.lt.s32.totalorder %s2266_s11, %s2266_s11 }
 0x5f6   :  { %p2273_p3 = por %p2272_p2, %p2271_p1 }
 0x5f8   :  { %p2274_p4 = pnand %p2273_p3, %p2267_p0 }
 0x658   :  { %v1509_v12 = vpop.permute.xlu0 %1508 }
 0x659   :  { %v1513_v13 = vpop.permute.xlu1 %1512  ;;  %v1519_v14 = vsel %vm182_vm2, %v971_v41, %v1509_v12  ;;  %v2189_v12 = vpack.c.bf16 %v1788_v11, %v1787_v10 }
 0x65a   :  { %v1521_v16 = vsel %vm1520_vm4, %v1519_v14, %v1513_v13  ;;  %v1789_v13 = vld [vmem:[%s2673_s4 + $0x40] sm:$0xff]  ;;  %v1790_v14 = vld [vmem:[%s2673_s4 + $0x48] sm:$0xff] }
 0x65d   :  { %v1517_v15 = vpop.permute.xlu1 %1516 }
 0x65e   :  { %v1523_v17 = vsel %vm1522_vm5, %v1521_v16, %v1517_v15  ;;  %v2193_v15 = vpack.c.bf16 %v1790_v14, %v1789_v13  ;;  %v1791_v16 = vld [vmem:[%s2673_s4 + $0x50] sm:$0xff] }
 0x65f   :  { %2104 = vmatprep.mubr.msk.f32.mxu1 %vm34_vm0, %v1523_v17  ;;  %v1792_v17 = vld [vmem:[%s2673_s4 + $0x58] sm:$0xff] }
 0x660   :  { %v1526_v18 = vpop.permute.xlu0 %1525 }
 0x661   :  { %v1536_v20 = vsel %vm182_vm2, %v1275_v5, %v1526_v18  ;;  %v1784_v5 = vld [vmem:[%s2673_s4 + $0x18] sm:$0xff]  ;;  %v2197_v18 = vpack.c.bf16 %v1792_v17, %v1791_v16 }
 0x662   :  { %v2181_v6 = vpack.c.bf16 %v1784_v5, %v1783_v4 }
 0x664   :  { %v1534_v19 = vpop.permute.xlu1 %1533  ;;  %2182 = vmatprep.subr.bf16.mxu0 %v2181_v6 }
 0x665   :  { %v1530_v21 = vpop.permute.xlu0 %1529  ;;  %2184 = vmatpush3.bf16.msra.mxu0 %v2181_v6 }
 0x666   :  { %v1537_v22 = vsel %vm1520_vm4, %v1536_v20, %v1530_v21  ;;  %2186 = vmatprep.subr.bf16.mxu0 %v2185_v9  ;;  %v1794_v20 = vld [vmem:[%s2673_s4 + $0x68] sm:$0xff] }
 0x667   :  { %v1538_v23 = vsel %vm1522_vm5, %v1537_v22, %v1534_v19  ;;  %v1793_v19 = vld [vmem:[%s2673_s4 + $0x60] sm:$0xff]  ;;  %v1795_v22 = vld [vmem:[%s2673_s4 + $0x70] sm:$0xff] }
 0x668   :  { %2105 = vmatmul.mubr.msk.f32.vlgmr.msra.gmra.mrb[20].mxu1 %vm34_vm0, %v1538_v23  ;;  %v2201_v21 = vpack.c.bf16 %v1794_v20, %v1793_v19  ;;  %v1796_v23 = vld [vmem:[%s2673_s4 + $0x78] sm:$0xff] }
 0x669   :  { %2172 = vmatpush3.bf16.msra.mxu1 %v2169_v50  ;;  %2188 = vmatpush3.bf16.msra.mxu0 %v2185_v9 }
 0x66a   :  { %2174 = vmatprep.subr.bf16.mxu1 %v2173_v40  ;;  %2190 = vmatprep.subr.bf16.mxu0 %v2189_v12 }
 0x66d   :  { %2176 = vmatpush3.bf16.msra.mxu1 %v2173_v40  ;;  %2192 = vmatpush3.bf16.msra.mxu0 %v2189_v12 }
 0x66e   :  { %2194 = vmatprep.subr.bf16.mxu0 %v2193_v15 }
 0x671   :  { %2196 = vmatpush3.bf16.msra.mxu0 %v2193_v15 }
 0x672   :  { %2198 = vmatprep.subr.bf16.mxu0 %v2197_v18 }
 0x675   :  { %2200 = vmatpush3.bf16.msra.mxu0 %v2197_v18 }
 0x676   :  { %2202 = vmatprep.subr.bf16.mxu0 %v2201_v21 }
 0x679   :  { %2204 = vmatpush3.bf16.msra.mxu0 %v2201_v21 }
 0x73b   :  { %v2106_v25 = vpop.f32.mrb[20].mxu1 }
 0x73c   :  { %v1626_v26 = vadd.f32 %v2106_v25, %v1928_v24  ;;  %v1620_v27 = vpop.f32.mrb[21].mxu1  ;;  %v1933_v25 = vld [vmem:[%s2676_s7] ss:$0 sm:$0xff] }
 0x73d   :  { %v1621_v48 = vadd.f32 %v1928_v24, %v1620_v27  ;;  %v2205_v24 = vpack.c.bf16 %v1796_v23, %v1795_v22 }
 0x73e   :  { %v2565_v28 = vadd.f32 %v1626_v26, %v2356_v1 }
 0x73f   :  { %v2568_v45 = vadd.f32 %v1621_v48, %v2351_v0  ;;  %2206 = vmatprep.subr.bf16.mxu0 %v2205_v24 }
 0x740   :  { %v1636_v29 = vsel %vm34_vm0, %v2565_v28, 0.0  ;;  %2208 = vmatpush3.bf16.msra.mxu0 %v2205_v24 }
 0x741   :  { %1637 = vadd.xlane.f32.xlu1 %v1636_v29  ;;  %v1633_v30 = vsel %vm34_vm0, %v2568_v45, 0.0 }
 0x742   :  { %1634 = vadd.xlane.f32.xlu0 %v1633_v30 }
 0x7ce   :  { %v1638_v31 = vpop.xlane.xlu1 %1637 }
 0x7cf   :  { %v1640_v32 = vmul.f32 0.03125, %v1638_v31  ;;  %v1635_v33 = vpop.xlane.xlu0 %1634 }
 0x7d0   :  { %v1639_v34 = vmul.f32 0.03125, %v1635_v33 }
 0x7d1   :  { %v1642_v35 = vsub.f32 %v2565_v28, %v1640_v32 }
 0x7d2   :  { %v1641_v1 = vsub.f32 %v2568_v45, %v1639_v34 }
 0x7d3   :  { %v1644_v38 = vmul.f32 %v1642_v35, %v1642_v35 }
 0x7d4   :  { %v1643_v37 = vmul.f32 %v1641_v1, %v1641_v1 }
 0x7d5   :  { %v1648_v39 = vsel %vm34_vm0, %v1644_v38, 0.0 }
 0x7d6   :  { %v1645_v0 = vsel %vm34_vm0, %v1643_v37, 0.0 }
 0x7d7   :  { %1646 = vadd.xlane.f32.xlu0 %v1645_v0 }
 0x7db   :  { %1649 = vadd.xlane.f32.xlu0 %v1648_v39 }
 0x864   :  { %v1647_v53 = vpop.xlane.xlu0 %1646 }
 0x865   :  { %v1651_v54 = vmul.f32 0.03125, %v1647_v53 }
 0x867   :  { %v1653_v41 = vadd.f32 1e-05, %v1651_v54 }
 0x868   :  { %v1650_v55 = vpop.xlane.xlu0 %1649 }
 0x869   :  { %2258 = vrsqrt.f32 %v1653_v41  ;;  %v1652_v46 = vmul.f32 0.03125, %v1650_v55 }
 0x86b   :  { %v1654_v56 = vadd.f32 1e-05, %v1652_v46 }
 0x86d   :  { %2260 = vrsqrt.f32 %v1654_v56 }
 0x873   :  { %v2259_v57 = vpop.eup %2258 }
 0x874   :  { %v1657_v58 = vmul.f32 %v2259_v57, %v1641_v1 }
 0x876   :  { %v1663_v60 = vmul.f32 %v1931_v36, %v1657_v58 }
 0x877   :  { %v2261_v61 = vpop.eup %2260 }
 0x878   :  { %v1658_v62 = vmul.f32 %v2261_v61, %v1642_v35  ;;  %v1669_v63 = vadd.f32 %v1932_v59, %v1663_v60 }
 0x87a   :  { %v1664_v2 = vmul.f32 %v1931_v36, %v1658_v62  ;;  %2115 = vmatprep.mubr.msk.f32.mxu1 %vm34_vm0, %v1669_v63 }
 0x87c   :  { %v1670_v3 = vadd.f32 %v1932_v59, %v1664_v2 }
 0x87e   :  { %2116 = vmatmul.mubr.msk.f32.vlgmr.msra.gmra.mrb[22].mxu1 %vm34_vm0, %v1670_v3 }
 0x951   :  { %v2117_v26 = vpop.f32.mrb[22].mxu1 }
 0x952   :  { %v1760_v27 = vadd.f32 %v2117_v26, %v1933_v25  ;;  %v1754_v48 = vpop.f32.mrb[23].mxu1 }
 0x953   :  { %v1755_v29 = vadd.f32 %v1933_v25, %v1754_v48 }
 0x954   :  { %v1766_v30 = vmul.f32 0.044715, %v1760_v27  ;;  %v1764_v42 = vmul.f32 0.5, %v1760_v27 }
 0x955   :  { %v1765_v31 = vmul.f32 0.044715, %v1755_v29  ;;  %v1763_v50 = vmul.f32 0.5, %v1755_v29 }
 0x956   :  { %v1768_v32 = vmul.f32 %v1766_v30, %v1760_v27 }
 0x957   :  { %v1767_v33 = vmul.f32 %v1765_v31, %v1755_v29 }
 0x958   :  { %v1770_v34 = vmul.f32 %v1768_v32, %v1760_v27 }
 0x959   :  { %v1769_v35 = vmul.f32 %v1767_v33, %v1755_v29 }
 0x95a   :  { %v1772_v1 = vadd.f32 %v1770_v34, %v1760_v27 }
 0x95b   :  { %v1771_v37 = vadd.f32 %v1769_v35, %v1755_v29 }
 0x95c   :  { %v1774_v0 = vmul.f32 0.7978846, %v1772_v1 }
 0x95d   :  { %v1773_v38 = vmul.f32 0.7978846, %v1771_v37 }
 0x95e   :  { %2262 = vtanh.f32 %v1774_v0 }
 0x95f   :  { %2264 = vtanh.f32 %v1773_v38 }
 0x968   :  { %v2263_v39 = vpop.eup %2262 }
 0x969   :  { %v2265_v47 = vpop.eup %2264  ;;  %v1778_v49 = vadd.f32 1.0, %v2263_v39 }
 0x96a   :  { %v1777_v43 = vadd.f32 1.0, %v2265_v47 }
 0x96b   :  { %v1780_v51 = vmul.f32 %v1778_v49, %v1764_v42 }
 0x96c   :  { %v1779_v40 = vmul.f32 %v1777_v43, %v1763_v50 }
 0x96e   :  { %2150 = vmatprep.mubr.f32.mxu0 %v1779_v40 }
 0x96f   :  { %2151 = vmatmul.mubr.f32.vlgmr.msra.gmra.mrb[14].mxu0 %v1780_v51 }
 0xa42   :  { %v2152_v52 = vpop.f32.mrb[14].mxu0 }
 0xa43   :  { %v1873_v53 = vadd.f32 %v2152_v52, %v2565_v28  ;;  %v1863_v54 = vpop.f32.mrb[15].mxu0 }
 0xa44   :  { %v1872_v41 = vadd.f32 %v1863_v54, %v2568_v45 }
 0xa45   :  { %v1880_v55 = vadd.f32 %v1936_v44, %v1873_v53 }
 0xa46   :  { %v1879_v46 = vadd.f32 %v1936_v44, %v1872_v41 }
 0xa47   :  { %1882 = vst.msk [vmem:[#allocation2 + $0x8] sm:$0xff] %vm34_vm0, %v1880_v55 }
 0xa48   :  { %1881 = vst.msk [vmem:[#allocation2] sm:$0xff] %vm34_vm0, %v1879_v46 }
 0xa49   :  { %2277 = shalt.err (!%p2274_p4)
}
 0xa4a   :  { %s2278_s2 = scalar_lea.hbm %s2677_s8, 256 }
 0xa4b   :  { %p2279_p5 = scmp.ne.s32.totalorder %s2677_s8, %s2278_s2  ;;  %p2282_p6 = scmp.lt.u32.totalorder %s2278_s2, %s2677_s8 }
 0xa4d   :  { %p2284_p7 = pnand %p2282_p6, %p2279_p5 }
 0xa4f   :  { %2287 = shalt.err (!%p2284_p7)
}
 0xa50   :  { %s2302_s17 = smov 128  }
 0xa51   :  { %1894 = dma.vmem_to_hbm [thread:$0]  %s1889_s9, 256, %s2677_s8, [#allocation3], %s2302_s17, %s2302_s17, %s2298_s10  }
 0xa52   :  { %2288 = dma.done.wait [#allocation3], 256  }
 0xa53   :  { %2289 = vsyncadd [#allocation3], 4294967040 }
 0xa54   :  { %1898 = vsyncpa [#allocation3], 1 }

</bundles_post_ra>
